<compile_context>
chip_gen: v7x
topology: tpu7x:2x2x1
jax: 0.10.0
libtpu: 0.0.40
codegen_flags: <defaults>
</compile_context>

<pallas_src>
import numpy as np
import jax
import jax.numpy as jnp
from jax.experimental import pallas as pl
from jax.experimental.pallas import tpu as pltpu

_LANE = 128            # vreg lane width: slab last dim -> full-lane unmasked vst
_SUBLANE = 8           # sublane quantum: row counts kept multiples of 8
_ROW_TILE = 8192       # 8192 x 128 x 4B = 4 MiB per f32 buffer; with in+out
                       # double-buffering ~16 MiB -> per-step pipeline overhead
                       # <10% even at v7x's 3.2 TB/s HBM bandwidth.
_VMEM_LIMIT_BYTES = 32 << 20   # explicit scoped-VMEM limit; safe on v5e/v6e/v7x


def _copy_kernel(x_ref, o_ref):
    # MODEL_ORACLE.forward has no arithmetic: pure streaming copy.
    o_ref[...] = x_ref[...]


def _round_up(x: int, m: int) -> int:
    return ((x + m - 1) // m) * m


def _pallas_lane_dense_copy(slab: jax.Array) -> jax.Array:
    """Identity copy of a (rows, 128) slab via a tiled Pallas kernel."""
    rows, cols = slab.shape
    assert cols == _LANE and rows % _SUBLANE == 0

    if rows <= _ROW_TILE:
        # Split even small slabs into >= 2 row blocks so the "parallel" grid axis
        # lets the two v7x TensorCores stream in parallel (harmless on v5e/v6e).
        block_rows = min(rows, _round_up(pl.cdiv(rows, 2), _SUBLANE))
    else:
        block_rows = _ROW_TILE

    grid = (pl.cdiv(rows, block_rows),)

    return pl.pallas_call(
        _copy_kernel,
        out_shape=jax.ShapeDtypeStruct((rows, cols), slab.dtype),
        grid=grid,
        in_specs=[pl.BlockSpec((block_rows, cols), lambda i: (i, 0))],
        out_specs=pl.BlockSpec((block_rows, cols), lambda i: (i, 0)),
        compiler_params=pltpu.CompilerParams(
            dimension_semantics=("parallel",),
            vmem_limit_bytes=_VMEM_LIMIT_BYTES,
        ),
    )(slab)


def model_oracle_forward(observation, dim: int,
                         use_pallas_copy: bool = False) -> jax.Array:
    """Replicates MODEL_ORACLE.forward: observation.view(-1, dim).

    Default (use_pallas_copy=False) is the fastest path on every TPU
    generation: the reshape is metadata-only, no kernel, no extra HBM traffic.
    The Pallas copy path is kept for demonstration and is tuned to run at
    (near) HBM roofline when enabled.
    """
    # torch: np.ndarray inputs are cast to float32; tensors keep their dtype.
    if isinstance(observation, np.ndarray):
        observation = jnp.asarray(observation, dtype=jnp.float32)

    flat = observation.reshape(-1, dim)      # same as torch .view(-1, dim); free

    if not use_pallas_copy:
        return flat

    total = flat.size
    if total % (_SUBLANE * _LANE) != 0:
        # A ragged slab would need pad + post-slice (extra full HBM passes) —
        # strictly worse than the free reshape, so skip the kernel.
        return flat

    # Lane-dense slab view: metadata-only reshape (no pad, no copy).
    slab = flat.reshape(total // _LANE, _LANE)
    out_slab = _pallas_lane_dense_copy(slab)
    return out_slab.reshape(-1, dim)         # metadata-only


if __name__ == "__main__":
    dim = 32
    key = jax.random.PRNGKey(0)
    # batch=2, agents=4, seq=16, feature dim=32 -> view(-1, 32) = (128, 32).
    # total = 4096 elements = multiple of 8*128, so the Pallas path runs
    # without any padding (slab = (32, 128), grid = (2,)).
    x = jax.random.normal(key, (2, 4, 16, dim), dtype=jnp.float32)

    ref = x.reshape(-1, dim)

    # Default (recommended) path: metadata-only reshape, no kernel.
    y_fast = model_oracle_forward(x, dim)
    jax.block_until_ready(y_fast)
    assert y_fast.shape == (128, dim), y_fast.shape
    assert jnp.array_equal(y_fast, ref), "fast-path mismatch"

    # Pallas copy path, exercised once.
    y_kernel = model_oracle_forward(x, dim, use_pallas_copy=True)
    jax.block_until_ready(y_kernel)
    assert y_kernel.shape == (128, dim), y_kernel.shape
    assert y_kernel.dtype == x.dtype, y_kernel.dtype      # dtype preserved
    assert jnp.array_equal(y_kernel, ref), "Pallas output mismatch"

    # numpy-input path (torch casts np.ndarray to float32).
    y_np = model_oracle_forward(np.asarray(x), dim, use_pallas_copy=True)
    jax.block_until_ready(y_np)
    assert y_np.dtype == jnp.float32
    assert jnp.array_equal(y_np, ref), "numpy-path mismatch"

    print("KERNEL_OK")
</pallas_src>

<mosaic_0001>
module attributes {stable_mosaic.version = 11 : i64} {
  func.func @_copy_kernel(%arg0: i32, %arg1: memref<16x128xf32, #tpu.memory_space<vmem>>, %arg2: memref<16x128xf32, #tpu.memory_space<vmem>>) attributes {dimension_semantics = [#tpu.dimension_semantics<parallel>], iteration_bounds = array<i64: 2>, scalar_prefetch = 0 : i64, scratch_operands = 0 : i64, tpu.core_type = #tpu.core_type<tc>, window_params = [{transform_indices = @transform_0, window_bounds = array<i64: 16, 128>}, {transform_indices = @transform_1, window_bounds = array<i64: 16, 128>}]} {
    %c0 = arith.constant 0 : index
    %c0_0 = arith.constant 0 : index
    %0 = vector.load %arg1[%c0, %c0_0] : memref<16x128xf32, #tpu.memory_space<vmem>>, vector<16x128xf32>
    %c0_1 = arith.constant 0 : index
    %c0_2 = arith.constant 0 : index
    %1 = vector.load %arg2[%c0_1, %c0_2] : memref<16x128xf32, #tpu.memory_space<vmem>>, vector<16x128xf32>
    tpu.vector_store %arg2[%c0_1, %c0_2], %0 {strides = array<i32>} : memref<16x128xf32, #tpu.memory_space<vmem>>, vector<16x128xf32>,
    return
  }
  func.func @transform_0(%arg0: i32) -> (i32, i32) {
    %c0_i32 = arith.constant 0 : i32
    %c0_i32_0 = arith.constant 0 : i32
    return %arg0, %c0_i32 : i32, i32
  }
  func.func @transform_1(%arg0: i32) -> (i32, i32) {
    %c0_i32 = arith.constant 0 : i32
    %c0_i32_0 = arith.constant 0 : i32
    return %arg0, %c0_i32 : i32, i32
  }
}

</mosaic_0001>

<bundles_post_ra>
// kernel: tpu_custom_call.1
= control target key start
LH: loop header
LB: loop body
LE: loop exit
PB: predicated region body
PF: predicated region fallthrough
CT: control target
= control target key end

     0   :  { %6 = vsyncpa [#allocation3], 0  ;;  %s570_s0 = inlined_call_operand.hbm [shape: f32[32,128], index: 0, kind: input, shape index: {}]   ;;  %s571_s1 = inlined_call_operand.hbm [shape: f32[32,128], index: 1, kind: output, shape index: {}]  }
   0x1   :  { %8 = vsyncpa [#allocation3 + $0x1], 0 }
   0x2   :  { %9 = vsyncpa [#allocation4], 0 }
   0x3   :  { %11 = vsyncpa [#allocation4 + $0x1], 0  ;;  %s408_s6 = smov 0   ;;  %s410_s7 = smov 0  }
   0x4   :  { %s412_s8 = smov 0   ;;  %s414_s9 = smov 0  }
   0x5 LB: > { %s429_s10 = sadd.s32 4294967295, %s390_s9   ;;  %s228_s11 = sadd.s32 4294967294, %s390_s9   ;;  %s390_s9 = sphi %s414_s9, %s584_s9   ;;  %s386_s8 = sphi %s412_s8, %s583_s8   ;;  %s382_s7 = sphi %s410_s7, %s582_s7   ;;  %s378_s6 = sphi %s408_s6, %s581_s6  }
   0x6   : > { %s433_s12 = sadd.s32 1, %s390_s9   ;;  %s24_s13 = sadd.s32 1, %s386_s8 }
   0x7   : > { %s21_s14 = ssub.s32 %s390_s9, %s433_s12  ;;  %p31_p0 = scmp.ne.s32.totalorder %s386_s8, %s382_s7 }
   0x8   : > { %p22_p1 = scmp.eq.s32.totalorder %s21_s14, 0  ;;  %p32_p2 = scmp.eq.s32.totalorder %s390_s9, 0 }
   0x9   : > { %p37_p3 = scmp.ne.s32.totalorder %s382_s7, %s378_s6  ;;  %p38_p4 = scmp.eq.s32.totalorder %s429_s10, 0 }
   0xa   : > { %s445_s15 = scalar_select %p22_p1, %s386_s8, %s24_s13  }
   0xb   : > { %p447_p5 = por %p32_p2, %p31_p0  ;;  %p451_p6 = por %p38_p4, %p37_p3 }
   0xc   : > { %p61_p7 = scmp.eq.s32.totalorder %s429_s10, 1  ;;  %p67_p8 = scmp.eq.s32.totalorder %s228_s11, 1 }
   0xd   : > { %p256_p10 = scmp.lt.s32.totalorder %s390_s9, 2  ;;  %s87_s20 = sand.u32 1, %s386_s8  }
   0xe   : > { %p458_p11 = por %p61_p7, %p31_p0  ;;  %p462_p12 = por %p67_p8, %p37_p3 }
   0xf   : > { %s242_s21 = sshll.u32 %s390_s9, 8  ;;  %s231_s22 = sshll.u32 %s87_s20, 4 }
  0x10   : > { %s575_s18 = scalar_select %p458_p11, 1, 0 }
  0x11   : > { %s576_s19 = scalar_select %p462_p12, 1, 0 }
  0x12   : > { %s471_s25 = scalar_lea.hbm %s570_s0, %s242_s21  ;;  %s91_s26 = scalar_lea.vmem [#allocation2], %s231_s22 }
  0x13   : > { %s98_s27 = sshll.u32 %s91_s26, 4  ;;  %p475_p13 = pnand %p256_p10, %p447_p5  ;;  %s479_s27 = int_to_ptr.vmem [resolvable:$true] %s98_s27 }
  0x14   : > { %s481_s29 = scalar_lea.sflag [#allocation3], %s87_s20  ;;  %s294_s30 = scalar_lea.hbm %s471_s25, 256 }
  0x15   : > { %p295_p0 = scmp.ne.s32.totalorder %s471_s25, %s294_s30  ;;  %p296_p1 = pneg %p475_p13 }
  0x16   : > { %s299_s4 = scalar_lea.hbm %s570_s0, 512  ;;  %p300_p4 = scmp.lt.u32.totalorder %s471_s25, %s570_s0 }
  0x17   : > { %p297_p2 = pnand %p296_p1, %p295_p0  ;;  %p301_p5 = scmp.lt.u32.totalorder %s299_s4, %s294_s30 }
  0x18   : > { %p303_p8 = scmp.lt.u32.totalorder %s294_s30, %s471_s25 }
  0x19   : > { %p298_p3 = pneg %p297_p2  ;;  %p302_p7 = por %p301_p5, %p300_p4 }
  0x1b   : > { %p304_p10 = por %p303_p8, %p302_p7 }
  0x1d   : > { %p305_p9 = pnand %p304_p10, %p298_p3 }
  0x1f   : > { %308 = shalt.err (!%p305_p9)
}
  0x20   : > { %s309_s13 = scalar_lea.vmem %s479_s27, 256  ;;  %s392_s14 = smov [#allocation2]  }
  0x21   : > { %p310_p0 = scmp.ne.s32.totalorder %s479_s27, %s309_s13  ;;  %s314_s16 = sshll.u32 %s392_s14, 4  ;;  %s315_s16 = int_to_ptr.vmem [resolvable:$false] %s314_s16 }
  0x22   : > { %s316_s20 = scalar_lea.vmem %s315_s16, 512  ;;  %p317_p11 = scmp.lt.s32.totalorder %s479_s27, %s315_s16 }
  0x23   : > { %p312_p2 = pnand %p310_p0, %p296_p1  ;;  %p318_p4 = scmp.lt.s32.totalorder %s316_s20, %s309_s13 }
  0x25   : > { %p313_p12 = pneg %p312_p2  ;;  %p319_p5 = por %p318_p4, %p317_p11 }
  0x27   : > { %p320_p7 = pnand %p319_p5, %p313_p12 }
  0x29   : > { %323 = shalt.err (!%p320_p7)
}
  0x2a   : > { %s393_s21 = smov 128   ;;  %s394_s22 = smov 8  }
  0x2b   : > { %251 = dma.hbm_to_vmem [thread:$0]  (!%p475_p13), %s471_s25, 256, %s479_s27, %s481_s29, %s393_s21, %s393_s21, %s394_s22  }
  0x2c   : > { %p234_p9 = scmp.ge.s32.totalorder %s390_s9, 1  ;;  %p106_p1 = scmp.lt.s32.totalorder %s390_s9, 3 }
  0x2e   : > { %p107_p3 = pnand %p234_p9, %p106_p1 }
  0x2f   : > { %s512_s23 = sand.u32 (!%p107_p3), 1, %s382_s7  }
  0x30   : > { %110 = sbr.rel (%p107_p3) target bundleno = 83 (0x53), region = 24  ;;  %s235_s24 = sshll.u32 (!%p107_p3), %s512_s23, 4 }
  0x31   : > { %s113_s26 = scalar_lea.sflag (!%p107_p3), [#allocation3], %s512_s23  ;;  %s116_s30 = scalar_lea.vmem (!%p107_p3), [#allocation2], %s235_s24 }
  0x37   : > { %369 = dma.done.wait (%p451_p6), %s113_s26, 256  }
  0x38   : > { %371 = vsyncadd (%p451_p6), %s113_s26, 4294967040  ;;  %s134_s25 = scalar_lea.vmem [#allocation5], %s235_s24  ;;  %s243_s28 = sshll.u32 %s429_s10, 8  ;;  %v137_v0 = vld [vmem:[%s116_s30] sm:$0xff]  ;;  %v138_v1 = vld [vmem:[%s116_s30 + $0x8] sm:$0xff] }
  0x39   : > { %s155_s27 = sshll.u32 %s134_s25, 4  ;;  %s526_s3 = scalar_lea.hbm %s571_s1, %s243_s28  ;;  %139 = vst [vmem:[%s134_s25] sm:$0xff] %v137_v0  ;;  %140 = vst [vmem:[%s134_s25 + $0x8] sm:$0xff] %v138_v1  ;;  %s521_s27 = int_to_ptr.vmem [resolvable:$true] %s155_s27 }
  0x3a   : > { %s142_s17 = scalar_lea.sflag [#allocation4], %s512_s23  ;;  %s324_s4 = scalar_lea.vmem %s521_s27, 256 }
  0x3b   : > { %p325_p6 = scmp.ne.s32.totalorder %s521_s27, %s324_s4  ;;  %p578_p11 = scmp.ne.s32.totalorder %s575_s18, 0 }
  0x3c   : > { %s395_s10 = smov [#allocation5]  }
  0x3d   : > { %p326_p12 = pnand %p325_p6, %p578_p11  ;;  %s328_s5 = sshll.u32 %s395_s10, 4  ;;  %s329_s5 = int_to_ptr.vmem [resolvable:$false] %s328_s5 }
  0x3e   : > { %s330_s11 = scalar_lea.vmem %s329_s5, 512  ;;  %p331_p8 = scmp.lt.s32.totalorder %s521_s27, %s329_s5 }
  0x3f   : > { %p327_p13 = pneg %p326_p12  ;;  %p332_p10 = scmp.lt.s32.totalorder %s330_s11, %s324_s4 }
  0x41   : > { %p333_p0 = por %p332_p10, %p331_p8 }
  0x43   : > { %p334_p2 = pnand %p333_p0, %p327_p13 }
  0x45   : > { %337 = shalt.err (!%p334_p2)
}
  0x46   : > { %s338_s13 = scalar_lea.hbm %s526_s3, 256  ;;  %s342_s20 = scalar_lea.hbm %s571_s1, 512 }
  0x47   : > { %p339_p4 = scmp.ne.s32.totalorder %s526_s3, %s338_s13  ;;  %p343_p9 = scmp.lt.u32.totalorder %s526_s3, %s571_s1 }
  0x48   : > { %p344_p1 = scmp.lt.u32.totalorder %s342_s20, %s338_s13  ;;  %p346_p6 = scmp.lt.u32.totalorder %s338_s13, %s526_s3 }
  0x49   : > { %p340_p5 = pnand %p339_p4, %p578_p11 }
  0x4a   : > { %p345_p3 = por %p344_p1, %p343_p9 }
  0x4b   : > { %p341_p7 = pneg %p340_p5 }
  0x4c   : > { %p347_p12 = por %p346_p6, %p345_p3 }
  0x4e   : > { %p348_p13 = pnand %p347_p12, %p341_p7 }
  0x50   : > { %351 = shalt.err (!%p348_p13)
}
  0x51   : > { %s396_s24 = smov 128   ;;  %s397_s26 = smov 8  }
  0x52   : > { %246 = dma.vmem_to_hbm [thread:$0]  (%p578_p11), %s521_s27, 256, %s526_s3, %s142_s17, %s396_s24, %s396_s24, %s397_s26  }
  0x53 PF: > { %s170_s30 = sand.u32 1, %s378_s6   ;;  %p579_p8 = scmp.ne.s32.totalorder %s576_s19, 0 }
  0x54   : > { %p580_p10 = scmp.ge.s32.totalorder %s390_s9, 2  ;;  %s171_s25 = scalar_lea.sflag [#allocation4], %s170_s30 }
  0x56   : > { %p253_p0 = pnand %p580_p10, %p579_p8 }
  0x58   : > { %373 = dma.done.wait (!%p253_p0), %s171_s25, 256  }
  0x59   : > { %375 = vsyncadd (!%p253_p0), %s171_s25, 4294967040  ;;  %p14_p2 = scmp.ge.s32.totalorder %s433_s12, 4   ;;  %s581_s6 = smov %s382_s7 }
  0x5a   : > { %s582_s7 = smov %s386_s8  ;;  %s583_s8 = smov %s445_s15 }
  0x5b   : > { %s584_s9 = smov %s433_s12  ;;  %16 = sbr.rel (!%p14_p2) target bundleno = 5 (0x5), region = 69 }
  0x62   :  { %176 = vsyncpa [#allocation3], 1 }
  0x63   :  { %178 = vsyncpa [#allocation3 + $0x1], 1 }
  0x64   :  { %179 = vsyncpa [#allocation4], 1 }
  0x65   :  { %181 = vsyncpa [#allocation4 + $0x1], 1 }

</bundles_post_ra>
